<compile_context>
chip_gen: v5e
topology: v5e:2x2
jax: 0.10.0
libtpu: 0.0.40
codegen_flags: <defaults>
</compile_context>

<pallas_src>
import functools

import jax
import jax.numpy as jnp
from jax.experimental import pallas as pl
from jax.experimental.pallas import tpu as pltpu

_LANE = 128


def _round_up(x, m):
    return (x + m - 1) // m * m


def _mlp3_kernel(x_ref, w1_ref, b1_ref, w2_ref, b2_ref, w3_ref, b3_ref, o_ref):
    """One batch tile of linear1 -> relu -> linear2 -> relu -> linear3.

    Weights are (in, out) layout with lane-padded output dims; biases are
    (1, out_pad) f32.  Every dot's inputs are in the weight dtype (bf16 fast
    path when prepared that way) while accumulation is f32 via
    preferred_element_type; the bias/ReLU epilogue is f32 on the VPU.
    """
    wdt = w1_ref.dtype
    # In-kernel cast of the streamed x tile: x arrives in its original dtype,
    # so its HBM stream is read exactly once (no wrapper-side astype copy).
    x = x_ref[...].astype(wdt)
    h1 = jnp.dot(x, w1_ref[...], preferred_element_type=jnp.float32) + b1_ref[...]
    h1 = jnp.maximum(h1, 0.0)                                    # ReLU, f32
    h2 = jnp.dot(h1.astype(wdt), w2_ref[...],
                 preferred_element_type=jnp.float32) + b2_ref[...]
    h2 = jnp.maximum(h2, 0.0)
    y = jnp.dot(h2.astype(wdt), w3_ref[...],
                preferred_element_type=jnp.float32) + b3_ref[...]
    o_ref[...] = y.astype(o_ref.dtype)


def prepare_params(w1, b1, w2, b2, w3, b3, compute_dtype=jnp.bfloat16,
                   lane_multiple=_LANE):
    """One-time (outside-jit) parameter prep.

    * Transposes PyTorch (out, in) weights to (in, out) so the kernel does
      plain row-major MXU matmuls -- no per-call transpose copies.
    * Zero-pads every output (lane) dim to a multiple of `lane_multiple`, and
      pads the contracting rows of w2/w3 to match the padded activations of
      the previous layer.  Padded hidden units stay exactly 0 (zero weight
      cols + zero bias + ReLU), so semantics are unchanged.
    * Weights are cast to `compute_dtype` (bf16 default: v6e/v7x MXU fast path
      and half the resident VMEM); biases stay f32 for the f32 epilogue.
    # TODO(synk): for large layers on v6e/v7x, pass lane_multiple=256 so both
    # 256-wide MXU passes stay fully occupied (128 is optimal on v5e).
    """
    def prep_w(w):
        out_f = w.shape[0]
        wt = w.T.astype(compute_dtype)                                  # (in, out)
        return jnp.pad(wt, ((0, 0), (0, _round_up(out_f, lane_multiple) - out_f)))

    def prep_b(b):
        out_f = b.shape[0]
        bp = jnp.pad(b.astype(jnp.float32),
                     (0, _round_up(out_f, lane_multiple) - out_f))
        return bp.reshape(1, -1)

    w1p = prep_w(w1)                                                    # (in,  H1p)
    w2p = prep_w(w2)                                                    # (H1,  H2p)
    w3p = prep_w(w3)                                                    # (H2,  Cp)
    # Pad contracting rows up to the padded width of the previous layer.
    w2p = jnp.pad(w2p, ((0, w1p.shape[1] - w2p.shape[0]), (0, 0)))      # (H1p, H2p)
    w3p = jnp.pad(w3p, ((0, w2p.shape[1] - w3p.shape[0]), (0, 0)))      # (H2p, Cp)
    return w1p, prep_b(b1), w2p, prep_b(b2), w3p, prep_b(b3)


def _vmem_capacity_bytes():
    """Per-core VMEM capacity (trace-time query); conservative fallback."""
    try:
        return int(pltpu.get_tpu_info().vmem_capacity_bytes)
    except Exception:
        return 64 << 20          # v7x per-TC VMEM; safe lower bound elsewhere


def _resident_spec(shape):
    """VMEM-resident block (constant index_map across the grid).

    Single-buffered: the block never changes between grid steps, so default
    double buffering would just waste VMEM (matters most on v7x's 64 MiB).
    """
    try:
        return pl.BlockSpec(shape, lambda i: (0, 0),
                            pipeline_mode=pl.Buffered(1))
    except (TypeError, AttributeError):      # older jax: fall back to default
        return pl.BlockSpec(shape, lambda i: (0, 0))


def _choose_tb(B, sub, block_batch, min_steps=2):
    """Pick the batch-tile size.

    Constraints honoured: multiple of the sublane count (8 f32 / 16 bf16) or
    equal to B; divides B when possible (so the wrapper never materializes a
    padded copy of x in HBM); yields >= `min_steps` grid steps when B permits
    (keeps both v7x TensorCores fed and gives the x/out pipeline overlap).
    """
    if B <= sub:
        return B                                  # full-array block, one step
    cap = max(sub, min(block_batch, B) // sub * sub)
    if B >= min_steps * sub:
        cap = min(cap, max(sub, _round_up(pl.cdiv(B, min_steps), sub)))
    for tb in range(cap, sub - 1, -sub):          # largest divisor of B first
        if B % tb == 0:
            return tb
    return cap                                    # ragged tail: pad last tile


@functools.partial(jax.jit, static_argnames=("nb_classes", "block_batch"))
def double_layer_neural_net(x, w1p, b1p, w2p, b2p, w3p, b3p, *,
                            nb_classes, block_batch=1024):
    """Forward pass of DoubleLayerNeuralNet on prepared (padded) params.

    x: (B, input_size); returns (B, nb_classes) in x's dtype.
    """
    B, in_size = x.shape
    h1p, h2p, cp = w1p.shape[1], w2p.shape[1], w3p.shape[1]
    out_dtype = x.dtype
    itemsize = x.dtype.itemsize

    # Batch tiling: weights stay VMEM-resident; x / out tiles are pipelined.
    sub = 16 if x.dtype == jnp.bfloat16 else 8
    tb = _choose_tb(B, sub, max(sub, (block_batch // sub) * sub))
    grid_n = pl.cdiv(B, tb)
    bp = grid_n * tb
    if bp != B:   # rare fallback: _choose_tb prefers tile sizes that divide B
        x = jnp.pad(x, ((0, bp - B), (0, 0)))

    # VMEM budget: single-buffered resident params + double-buffered x/out
    # tiles + f32 intermediates, clamped to ~3/4 of this chip's VMEM.
    param_bytes = sum(a.size * a.dtype.itemsize
                      for a in (w1p, b1p, w2p, b2p, w3p, b3p))
    streamed = 2 * tb * (in_size + cp) * itemsize
    act_bytes = tb * (h1p + h2p) * 4
    budget = _vmem_capacity_bytes() * 3 // 4
    # TODO(synk): if this assert ever fires (huge hidden layers), switch to a
    # K/N-tiled grid with an f32 accumulator scratch and an "arbitrary"
    # reduction axis instead of fully-resident weights.
    assert param_bytes + streamed + 2 * act_bytes <= budget, (
        "resident weights + streamed tiles exceed this chip's VMEM budget")
    vmem_limit = int(max(32 << 20,
                         min(param_bytes + streamed + 2 * act_bytes + (8 << 20),
                             budget)))

    # Advisory cost for XLA scheduling around the custom call.
    cost = pl.CostEstimate(
        flops=2 * bp * (in_size * h1p + h1p * h2p + h2p * cp),
        transcendentals=0,
        bytes_accessed=(bp * in_size * itemsize + param_bytes
                        + bp * cp * itemsize),
    )

    out = pl.pallas_call(
        _mlp3_kernel,
        out_shape=jax.ShapeDtypeStruct((bp, cp), out_dtype),
        grid_spec=pl.GridSpec(
            grid=(grid_n,),
            in_specs=[
                pl.BlockSpec((tb, in_size), lambda i: (i, 0)),  # streamed x
                _resident_spec(w1p.shape),                      # resident, 1-buf
                _resident_spec(b1p.shape),
                _resident_spec(w2p.shape),
                _resident_spec(b2p.shape),
                _resident_spec(w3p.shape),
                _resident_spec(b3p.shape),
            ],
            out_specs=pl.BlockSpec((tb, cp), lambda i: (i, 0)),  # lane-dense
        ),
        compiler_params=pltpu.CompilerParams(
            dimension_semantics=("parallel",),   # independent batch tiles
            vmem_limit_bytes=vmem_limit),
        cost_estimate=cost,
    )(x, w1p, b1p, w2p, b2p, w3p, b3p)

    # Output already in the caller's dtype; just drop batch/lane padding.
    return out[:B, :nb_classes]


def _init_linear(key, out_features, in_features):
    """Deterministic init mimicking PyTorch nn.Linear defaults."""
    kw, kb = jax.random.split(key)
    bound = 1.0 / (in_features ** 0.5)
    w = jax.random.uniform(kw, (out_features, in_features),
                           jnp.float32, -bound, bound)
    b = jax.random.uniform(kb, (out_features,), jnp.float32, -bound, bound)
    return w, b


if __name__ == "__main__":
    # Small MNIST-ish shapes consistent with the module.
    batch = 8
    input_size = 64
    hidden_size1 = 32
    hidden_size2 = 32
    nb_classes = 10

    key = jax.random.PRNGKey(0)
    kx, k1, k2, k3 = jax.random.split(key, 4)

    x = jax.random.normal(kx, (batch, input_size), jnp.float32)
    w1, b1 = _init_linear(k1, hidden_size1, input_size)
    w2, b2 = _init_linear(k2, hidden_size2, hidden_size1)
    w3, b3 = _init_linear(k3, nb_classes, hidden_size2)

    # Reference in plain JAX (same semantics as the PyTorch module).
    h1 = jnp.maximum(x @ w1.T + b1, 0.0)
    h2 = jnp.maximum(h1 @ w2.T + b2, 0.0)
    ref = h2 @ w3.T + b3

    # f32 weights: tight numerical check of the fused kernel.
    params_f32 = prepare_params(w1, b1, w2, b2, w3, b3,
                                compute_dtype=jnp.float32)
    out_f32 = jax.block_until_ready(
        double_layer_neural_net(x, *params_f32, nb_classes=nb_classes))
    assert out_f32.shape == (batch, nb_classes)
    assert out_f32.dtype == x.dtype
    assert jnp.allclose(out_f32, ref, atol=1e-5, rtol=1e-5), "f32 mismatch"

    # bf16 weights (MXU fast path on v6e/v7x), f32 accumulation in-kernel:
    # looser tolerance for bf16 input rounding.
    params_bf16 = prepare_params(w1, b1, w2, b2, w3, b3,
                                 compute_dtype=jnp.bfloat16)
    out_bf16 = jax.block_until_ready(
        double_layer_neural_net(x, *params_bf16, nb_classes=nb_classes))
    assert out_bf16.shape == (batch, nb_classes)
    assert jnp.allclose(out_bf16, ref, atol=5e-2, rtol=5e-2), "bf16 mismatch"

    print("KERNEL_OK")
</pallas_src>

<mosaic_0001>
module attributes {stable_mosaic.version = 11 : i64} {
  func.func @_mlp3_kernel(%arg0: i32, %arg1: memref<8x64xf32, #tpu.memory_space<vmem>>, %arg2: memref<64x128xf32, #tpu.memory_space<vmem>>, %arg3: memref<1x128xf32, #tpu.memory_space<vmem>>, %arg4: memref<128x128xf32, #tpu.memory_space<vmem>>, %arg5: memref<1x128xf32, #tpu.memory_space<vmem>>, %arg6: memref<128x128xf32, #tpu.memory_space<vmem>>, %arg7: memref<1x128xf32, #tpu.memory_space<vmem>>, %arg8: memref<8x128xf32, #tpu.memory_space<vmem>>) attributes {dimension_semantics = [#tpu.dimension_semantics<parallel>], iteration_bounds = array<i64: 1>, scalar_prefetch = 0 : i64, scratch_operands = 0 : i64, tpu.core_type = #tpu.core_type<tc>, window_params = [{transform_indices = @transform_0, window_bounds = array<i64: 8, 64>}, {pipeline_mode = #tpu.pipeline_mode<synchronous>, transform_indices = @transform_1, window_bounds = array<i64: 64, 128>}, {pipeline_mode = #tpu.pipeline_mode<synchronous>, transform_indices = @transform_2, window_bounds = array<i64: 1, 128>}, {pipeline_mode = #tpu.pipeline_mode<synchronous>, transform_indices = @transform_3, window_bounds = array<i64: 128, 128>}, {pipeline_mode = #tpu.pipeline_mode<synchronous>, transform_indices = @transform_4, window_bounds = array<i64: 1, 128>}, {pipeline_mode = #tpu.pipeline_mode<synchronous>, transform_indices = @transform_5, window_bounds = array<i64: 128, 128>}, {pipeline_mode = #tpu.pipeline_mode<synchronous>, transform_indices = @transform_6, window_bounds = array<i64: 1, 128>}, {transform_indices = @transform_7, window_bounds = array<i64: 8, 128>}]} {
    %c0 = arith.constant 0 : index
    %c0_0 = arith.constant 0 : index
    %0 = vector.load %arg1[%c0, %c0_0] : memref<8x64xf32, #tpu.memory_space<vmem>>, vector<8x64xf32>
    %c0_1 = arith.constant 0 : index
    %c0_2 = arith.constant 0 : index
    %1 = vector.load %arg2[%c0_1, %c0_2] : memref<64x128xf32, #tpu.memory_space<vmem>>, vector<64x128xf32>
    %cst = arith.constant dense<0.000000e+00> : vector<8x128xf32>
    %2 = tpu.matmul %0, %1, %cst {dimension_numbers = #tpu.dot_dimension_numbers<[1], [0], [0], [1], [0, 0, 1, 1], [], []>} : vector<8x64xf32>, vector<64x128xf32>, vector<8x128xf32> -> vector<8x128xf32>
    %c0_3 = arith.constant 0 : index
    %c0_4 = arith.constant 0 : index
    %3 = vector.load %arg3[%c0_3, %c0_4] : memref<1x128xf32, #tpu.memory_space<vmem>>, vector<1x128xf32>
    %4 = vector.broadcast %3 : vector<1x128xf32> to vector<8x128xf32>
    %5 = arith.addf %2, %4 : vector<8x128xf32>
    %cst_5 = arith.constant 0.000000e+00 : f32
    %6 = vector.broadcast %cst_5 : f32 to vector<8x128xf32>
    %7 = arith.maximumf %5, %6 : vector<8x128xf32>
    %c0_6 = arith.constant 0 : index
    %c0_7 = arith.constant 0 : index
    %8 = vector.load %arg4[%c0_6, %c0_7] : memref<128x128xf32, #tpu.memory_space<vmem>>, vector<128x128xf32>
    %cst_8 = arith.constant dense<0.000000e+00> : vector<8x128xf32>
    %9 = tpu.matmul %7, %8, %cst_8 {dimension_numbers = #tpu.dot_dimension_numbers<[1], [0], [0], [1], [0, 0, 1, 1], [], []>} : vector<8x128xf32>, vector<128x128xf32>, vector<8x128xf32> -> vector<8x128xf32>
    %c0_9 = arith.constant 0 : index
    %c0_10 = arith.constant 0 : index
    %10 = vector.load %arg5[%c0_9, %c0_10] : memref<1x128xf32, #tpu.memory_space<vmem>>, vector<1x128xf32>
    %11 = vector.broadcast %10 : vector<1x128xf32> to vector<8x128xf32>
    %12 = arith.addf %9, %11 : vector<8x128xf32>
    %cst_11 = arith.constant 0.000000e+00 : f32
    %13 = vector.broadcast %cst_11 : f32 to vector<8x128xf32>
    %14 = arith.maximumf %12, %13 : vector<8x128xf32>
    %c0_12 = arith.constant 0 : index
    %c0_13 = arith.constant 0 : index
    %15 = vector.load %arg6[%c0_12, %c0_13] : memref<128x128xf32, #tpu.memory_space<vmem>>, vector<128x128xf32>
    %cst_14 = arith.constant dense<0.000000e+00> : vector<8x128xf32>
    %16 = tpu.matmul %14, %15, %cst_14 {dimension_numbers = #tpu.dot_dimension_numbers<[1], [0], [0], [1], [0, 0, 1, 1], [], []>} : vector<8x128xf32>, vector<128x128xf32>, vector<8x128xf32> -> vector<8x128xf32>
    %c0_15 = arith.constant 0 : index
    %c0_16 = arith.constant 0 : index
    %17 = vector.load %arg7[%c0_15, %c0_16] : memref<1x128xf32, #tpu.memory_space<vmem>>, vector<1x128xf32>
    %18 = vector.broadcast %17 : vector<1x128xf32> to vector<8x128xf32>
    %19 = arith.addf %16, %18 : vector<8x128xf32>
    %c0_17 = arith.constant 0 : index
    %c0_18 = arith.constant 0 : index
    %20 = vector.load %arg8[%c0_17, %c0_18] : memref<8x128xf32, #tpu.memory_space<vmem>>, vector<8x128xf32>
    tpu.vector_store %arg8[%c0_17, %c0_18], %19 {strides = array<i32>} : memref<8x128xf32, #tpu.memory_space<vmem>>, vector<8x128xf32>,
    return
  }
  func.func @transform_0(%arg0: i32) -> (i32, i32) {
    %c0_i32 = arith.constant 0 : i32
    %c0_i32_0 = arith.constant 0 : i32
    return %arg0, %c0_i32 : i32, i32
  }
  func.func @transform_1(%arg0: i32) -> (i32, i32) {
    %c0_i32 = arith.constant 0 : i32
    %c0_i32_0 = arith.constant 0 : i32
    %c0_i32_1 = arith.constant 0 : i32
    return %c0_i32, %c0_i32_0 : i32, i32
  }
  func.func @transform_2(%arg0: i32) -> (i32, i32) {
    %c0_i32 = arith.constant 0 : i32
    %c0_i32_0 = arith.constant 0 : i32
    %c0_i32_1 = arith.constant 0 : i32
    return %c0_i32, %c0_i32_0 : i32, i32
  }
  func.func @transform_3(%arg0: i32) -> (i32, i32) {
    %c0_i32 = arith.constant 0 : i32
    %c0_i32_0 = arith.constant 0 : i32
    %c0_i32_1 = arith.constant 0 : i32
    return %c0_i32, %c0_i32_0 : i32, i32
  }
  func.func @transform_4(%arg0: i32) -> (i32, i32) {
    %c0_i32 = arith.constant 0 : i32
    %c0_i32_0 = arith.constant 0 : i32
    %c0_i32_1 = arith.constant 0 : i32
    return %c0_i32, %c0_i32_0 : i32, i32
  }
  func.func @transform_5(%arg0: i32) -> (i32, i32) {
    %c0_i32 = arith.constant 0 : i32
    %c0_i32_0 = arith.constant 0 : i32
    %c0_i32_1 = arith.constant 0 : i32
    return %c0_i32, %c0_i32_0 : i32, i32
  }
  func.func @transform_6(%arg0: i32) -> (i32, i32) {
    %c0_i32 = arith.constant 0 : i32
    %c0_i32_0 = arith.constant 0 : i32
    %c0_i32_1 = arith.constant 0 : i32
    return %c0_i32, %c0_i32_0 : i32, i32
  }
  func.func @transform_7(%arg0: i32) -> (i32, i32) {
    %c0_i32 = arith.constant 0 : i32
    %c0_i32_0 = arith.constant 0 : i32
    return %arg0, %c0_i32 : i32, i32
  }
}

</mosaic_0001>

<bundles_post_ra>
// kernel: double_layer_neural_net.1
= control target key start
LH: loop header
LB: loop body
LE: loop exit
PB: predicated region body
PF: predicated region fallthrough
CT: control target
= control target key end

     0   :  { %12 = vsyncpa [#allocation3], 0  ;;  %s437_s0 = inlined_call_operand.hbm [shape: f32[8,64], index: 0, kind: input, shape index: {}]   ;;  %s438_s1 = inlined_call_operand.hbm [shape: f32[64,128], index: 1, kind: input, shape index: {}]   ;;  %s439_s2 = inlined_call_operand.vmem [shape: f32[1,128], index: 2, kind: input, shape index: {}]   ;;  %s440_s3 = inlined_call_operand.hbm [shape: f32[128,128], index: 3, kind: input, shape index: {}]   ;;  %s441_s4 = inlined_call_operand.vmem [shape: f32[1,128], index: 4, kind: input, shape index: {}]   ;;  %s442_s5 = inlined_call_operand.hbm [shape: f32[128,128], index: 5, kind: input, shape index: {}]   ;;  %s443_s6 = inlined_call_operand.vmem [shape: f32[1,128], index: 6, kind: input, shape index: {}]   ;;  %s444_s7 = inlined_call_operand.hbm [shape: f32[8,128], index: 7, kind: output, shape index: {}]  }
   0x1   :  { %13 = vsyncpa [#allocation6], 0 }
   0x2   :  { %14 = vsyncpa [#allocation9], 0  ;;  %s31_s26 = sshll.u32 %s438_s1, 4  ;;  %s32_s26 = int_to_ptr.hbm [resolvable:$true] %s31_s26 }
   0x3   :  { %15 = vsyncpa [#allocation4], 0  ;;  %s366_s27 = smov [#allocation5]   ;;  %s21_s8 = sshll.u32 %s437_s0, 4  ;;  %s22_s8 = int_to_ptr.hbm [resolvable:$true] %s21_s8 }
   0x4   :  { %s33_s28 = sshll.u32 %s366_s27, 4  ;;  %s367_s9 = smov 128   ;;  %s34_s28 = int_to_ptr.vmem [resolvable:$true] %s33_s28 }
   0x5   :  { %s368_s10 = smov 8   ;;  %s369_s11 = smov [#allocation2]  }
   0x6   :  { %39 = dma.hbm_to_vmem [thread:$0]  %s32_s26, 1024, %s34_s28, [#allocation6], %s367_s9, %s367_s9, %s368_s10  }
   0x7   :  { %s23_s12 = sshll.u32 %s369_s11, 4  ;;  %s46_s15 = sshll.u32 %s440_s3, 4  ;;  %s24_s12 = int_to_ptr.vmem [resolvable:$true] %s23_s12  ;;  %s47_s15 = int_to_ptr.hbm [resolvable:$true] %s46_s15 }
   0x8   :  { %26 = dma.hbm_to_vmem [thread:$0]  %s22_s8, 128, %s24_s12, [#allocation3]  }
   0x9   :  { %s61_s17 = sshll.u32 %s442_s5, 4  ;;  %s370_s18 = smov [#allocation7]   ;;  %s62_s17 = int_to_ptr.hbm [resolvable:$true] %s61_s17 }
   0xa   :  { %s48_s19 = sshll.u32 %s370_s18, 4  ;;  %s371_s0 = smov [#allocation8]   ;;  %s49_s19 = int_to_ptr.vmem [resolvable:$true] %s48_s19 }
   0xb   :  { %54 = dma.hbm_to_vmem [thread:$0]  %s47_s15, 2048, %s49_s19, [#allocation6], %s367_s9, %s367_s9, %s368_s10  }
   0xc   :  { %s63_s20 = sshll.u32 %s371_s0, 4  ;;  %s64_s20 = int_to_ptr.vmem [resolvable:$true] %s63_s20 }
   0xd   :  { %69 = dma.hbm_to_vmem [thread:$0]  %s62_s17, 2048, %s64_s20, [#allocation9], %s367_s9, %s367_s9, %s368_s10  }
   0xe   :  { %358 = dma.done.wait [#allocation3], 128  }
   0xf   :  { %359 = vsyncadd [#allocation3], 4294967168 }
  0x10   :  { %360 = dma.done.wait [#allocation6], 3072  }
  0x11   :  { %361 = vsyncadd [#allocation6], 4294964224 }
  0x12   :  { %362 = dma.done.wait [#allocation9], 2048  }
  0x13   :  { %363 = vsyncadd [#allocation9], 4294965248  ;;  %v96_v0 = vld [vmem:[#allocation5 + $0x38] sm:$0xff]  ;;  %v95_v1 = vld [vmem:[#allocation5 + $0x30] sm:$0xff]  ;;  %vm101_vm0 = vcmask 523264   ;;  %s372_s24 = smov [#allocation10]  }
  0x14   :  { %113 = vmatpush.msra.mxu0 %v96_v0  ;;  %v94_v2 = vld [vmem:[#allocation5 + $0x28] sm:$0xff]  ;;  %v141_v3 = vld [vmem:[#allocation7 + $0x78] sm:$0xff]  ;;  %v140_v4 = vld [vmem:[#allocation7 + $0x70] sm:$0xff]  ;;  %s213_s25 = sshll.u32 %s372_s24, 4  ;;  %s215_s28 = sshll.u32 %s444_s7, 4  ;;  %s214_s25 = int_to_ptr.vmem [resolvable:$true] %s213_s25  ;;  %s216_s28 = int_to_ptr.hbm [resolvable:$true] %s215_s28 }
  0x15   :  { %v93_v5 = vld [vmem:[#allocation5 + $0x20] sm:$0xff]  ;;  %146 = vmatpush.msra.mxu1 %v141_v3  ;;  %v139_v6 = vld [vmem:[#allocation7 + $0x68] sm:$0xff]  ;;  %v92_v7 = vld [vmem:[#allocation5 + $0x18] sm:$0xff] }
  0x16   :  { %114 = vmatpush.msra.mxu0 %v95_v1  ;;  %v138_v8 = vld [vmem:[#allocation7 + $0x60] sm:$0xff]  ;;  %v91_v9 = vld [vmem:[#allocation5 + $0x10] sm:$0xff]  ;;  %v137_v10 = vld [vmem:[#allocation7 + $0x58] sm:$0xff] }
  0x17   :  { %147 = vmatpush.msra.mxu1 %v140_v4  ;;  %v90_v11 = vld [vmem:[#allocation5 + $0x8] sm:$0xff]  ;;  %v136_v12 = vld [vmem:[#allocation7 + $0x50] sm:$0xff]  ;;  %v89_v13 = vld [vmem:[#allocation5] sm:$0xff] }
  0x18   :  { %115 = vmatpush.msra.mxu0 %v94_v2  ;;  %v88_v14 = vld [vmem:[#allocation2] sm:$0xff]  ;;  %v135_v15 = vld [vmem:[#allocation7 + $0x48] sm:$0xff]  ;;  %v134_v16 = vld [vmem:[#allocation7 + $0x40] sm:$0xff] }
  0x19   :  { %148 = vmatpush.msra.mxu1 %v139_v6  ;;  %v133_v17 = vld [vmem:[#allocation7 + $0x38] sm:$0xff]  ;;  %v132_v18 = vld [vmem:[#allocation7 + $0x30] sm:$0xff]  ;;  %v131_v19 = vld [vmem:[#allocation7 + $0x28] sm:$0xff] }
  0x1a   :  { %116 = vmatpush.msra.mxu0 %v93_v5  ;;  %v130_v20 = vld [vmem:[#allocation7 + $0x20] sm:$0xff]  ;;  %v129_v21 = vld [vmem:[#allocation7 + $0x18] sm:$0xff]  ;;  %v128_v22 = vld [vmem:[#allocation7 + $0x10] sm:$0xff] }
  0x1b   :  { %149 = vmatpush.msra.mxu1 %v138_v8  ;;  %v127_v23 = vld [vmem:[#allocation7 + $0x8] sm:$0xff]  ;;  %v126_v24 = vld [vmem:[#allocation7] sm:$0xff]  ;;  %v182_v25 = vld [vmem:[#allocation8 + $0x78] sm:$0xff] }
  0x1c   :  { %117 = vmatpush.msra.mxu0 %v92_v7  ;;  %v181_v26 = vld [vmem:[#allocation8 + $0x70] sm:$0xff]  ;;  %187 = vmatpush.msra.mxu2 %v182_v25  ;;  %v180_v27 = vld [vmem:[#allocation8 + $0x68] sm:$0xff]  ;;  %v179_v28 = vld [vmem:[#allocation8 + $0x60] sm:$0xff] }
  0x1d   :  { %150 = vmatpush.msra.mxu1 %v137_v10  ;;  %v178_v29 = vld [vmem:[#allocation8 + $0x58] sm:$0xff]  ;;  %v177_v30 = vld [vmem:[#allocation8 + $0x50] sm:$0xff]  ;;  %v176_v31 = vld [vmem:[#allocation8 + $0x48] sm:$0xff] }
  0x1e   :  { %118 = vmatpush.msra.mxu0 %v91_v9  ;;  %188 = vmatpush.msra.mxu2 %v181_v26  ;;  %v175_v32 = vld [vmem:[#allocation8 + $0x40] sm:$0xff]  ;;  %v174_v33 = vld [vmem:[#allocation8 + $0x38] sm:$0xff]  ;;  %v173_v34 = vld [vmem:[#allocation8 + $0x30] sm:$0xff] }
  0x1f   :  { %151 = vmatpush.msra.mxu1 %v136_v12  ;;  %v172_v35 = vld [vmem:[#allocation8 + $0x28] sm:$0xff]  ;;  %v171_v36 = vld [vmem:[#allocation8 + $0x20] sm:$0xff]  ;;  %v170_v37 = vld [vmem:[#allocation8 + $0x18] sm:$0xff] }
  0x20   :  { %119 = vmatpush.msra.mxu0 %v90_v11  ;;  %189 = vmatpush.msra.mxu2 %v180_v27  ;;  %v235_v38 = vld [vmem:[%s439_s2] ss:$0 sm:$0xff]  ;;  %v169_v42 = vld [vmem:[#allocation8 + $0x10] sm:$0xff]  ;;  %v168_v43 = vld [vmem:[#allocation8 + $0x8] sm:$0xff] }
  0x21   :  { %152 = vmatpush.msra.mxu1 %v135_v15  ;;  %v167_v44 = vld [vmem:[#allocation8] sm:$0xff]  ;;  %v236_v45 = vld [vmem:[%s441_s4] ss:$0 sm:$0xff] }
  0x22   :  { %120 = vmatpush.msra.mxu0 %v89_v13  ;;  %190 = vmatpush.msra.mxu2 %v179_v28  ;;  %v237_v49 = vld [vmem:[%s443_s6] ss:$0 sm:$0xff] }
  0x23   :  { %227 = vmatmul.msk.f32.vlgmr.msra.gmra.mxu0 %vm101_vm0, %v88_v14  ;;  %153 = vmatpush.msra.mxu1 %v134_v16 }
  0x24   :  { %191 = vmatpush.msra.mxu2 %v178_v29 }
  0x25   :  { %154 = vmatpush.msra.mxu1 %v133_v17 }
  0x26   :  { %192 = vmatpush.msra.mxu2 %v177_v30 }
  0x27   :  { %155 = vmatpush.msra.mxu1 %v132_v18 }
  0x28   :  { %193 = vmatpush.msra.mxu2 %v176_v31 }
  0x29   :  { %156 = vmatpush.msra.mxu1 %v131_v19 }
  0x2a   :  { %194 = vmatpush.msra.mxu2 %v175_v32 }
  0x2b   :  { %157 = vmatpush.msra.mxu1 %v130_v20 }
  0x2c   :  { %195 = vmatpush.msra.mxu2 %v174_v33 }
  0x2d   :  { %158 = vmatpush.msra.mxu1 %v129_v21 }
  0x2e   :  { %196 = vmatpush.msra.mxu2 %v173_v34 }
  0x2f   :  { %159 = vmatpush.msra.mxu1 %v128_v22 }
  0x30   :  { %197 = vmatpush.msra.mxu2 %v172_v35 }
  0x31   :  { %160 = vmatpush.msra.mxu1 %v127_v23 }
  0x32   :  { %198 = vmatpush.msra.mxu2 %v171_v36 }
  0x33   :  { %161 = vmatpush.msra.mxu1 %v126_v24 }
  0x34   :  { %199 = vmatpush.msra.mxu2 %v170_v37 }
  0x36   :  { %200 = vmatpush.msra.mxu2 %v169_v42 }
  0x38   :  { %201 = vmatpush.msra.mxu2 %v168_v43 }
  0x3a   :  { %202 = vmatpush.msra.mxu2 %v167_v44 }
  0xa0   :  { %v122_v39 = vpop.f32.mrf.mxu0 }
  0xa1   :  { %v123_v40 = vadd.f32 %v235_v38, %v122_v39 }
  0xa3   :  { %v125_v41 = vmax.f32 %v123_v40, 0.0 }
  0xa5   :  { %162 = vmatmul.f32.vlgmr.msra.gmra.mxu1 %v125_v41 }
 0x122   :  { %v163_v46 = vpop.f32.mrf.mxu1 }
 0x123   :  { %v164_v47 = vadd.f32 %v236_v45, %v163_v46 }
 0x125   :  { %v166_v48 = vmax.f32 %v164_v47, 0.0 }
 0x127   :  { %203 = vmatmul.f32.vlgmr.msra.gmra.mxu2 %v166_v48 }
 0x1aa   :  { %v204_v50 = vpop.f32.mrf.mxu2 }
 0x1ab   :  { %v205_v51 = vadd.f32 %v237_v49, %v204_v50 }
 0x1ad   :  { %207 = vst [vmem:[#allocation10] sm:$0xff] %v205_v51 }
 0x1ae   :  { %218 = dma.vmem_to_hbm [thread:$0]  %s214_s25, 128, %s216_s28, [#allocation4]  }
 0x1af   :  { %364 = dma.done.wait [#allocation4], 128  }
 0x1b0   :  { %365 = vsyncadd [#allocation4], 4294967168 }
 0x1b1   :  { %223 = vsyncpa [#allocation3], 1 }
 0x1b2   :  { %224 = vsyncpa [#allocation6], 1 }
 0x1b3   :  { %225 = vsyncpa [#allocation9], 1 }
 0x1b4   :  { %226 = vsyncpa [#allocation4], 1 }

</bundles_post_ra>
